<compile_context>
chip_gen: v5e
topology: v5e:2x2
jax: 0.10.0
libtpu: 0.0.40
codegen_flags: <defaults>
</compile_context>

<pallas_src>
import functools

import jax
import jax.numpy as jnp
from jax.experimental import pallas as pl
from jax.experimental.pallas import tpu as pltpu


def _contrast_kernel(x_ref, w1_ref, w2_ref, pos_ref, out_ref, *,
                     inv_tau, lam, n):
    # ---- projection MLP on the stacked [2N, Hp] bf16 block ------------------
    # Biases are already folded into row H of w1/w2 against x's ones lane.
    x = x_ref[...]                                       # bf16
    h = jnp.dot(x, w1_ref[...], preferred_element_type=jnp.float32)
    # ELU (alpha=1.0), strictly f32 elementwise (v5e has no bf16 VPU/EUP).
    h = jnp.where(h > 0, h, jnp.exp(h) - 1.0)
    z = jnp.dot(h.astype(jnp.bfloat16), w2_ref[...],
                preferred_element_type=jnp.float32)

    # ---- L2 normalize (F.normalize: dim=-1, p=2, eps=1e-12) via rsqrt -------
    sumsq = jnp.sum(z * z, axis=-1, keepdims=True)
    nrm = z * jax.lax.rsqrt(jnp.maximum(sumsq, 1e-24))   # == z / max(||z||,1e-12)

    n1 = nrm[:n, :]
    n2 = nrm[n:, :]
    n1b = n1.astype(jnp.bfloat16)
    n2b = n2.astype(jnp.bfloat16)
    n1s = (n1 * inv_tau).astype(jnp.bfloat16)            # fold 1/tau once, O(N*H)
    n2s = (n2 * inv_tau).astype(jnp.bfloat16)

    # positive_matrix arrives as int8; apply it as an f32 masked select.
    mask = pos_ref[...].astype(jnp.float32) > 0.5

    def branch(a_scaled, b):
        # exp(a @ b.T / tau) with the row softmax-normalization folded into a
        # per-row num/den ratio: no N*N divides, no materialized transposes.
        s = jax.lax.dot_general(a_scaled, b, (((1,), (1,)), ((), ())),
                                preferred_element_type=jnp.float32)
        e = jnp.exp(s)                                   # f32 exp, v5e-safe
        num = jnp.sum(jnp.where(mask, e, 0.0), axis=-1, keepdims=True)  # [N,1]
        den = jnp.sum(e, axis=-1, keepdims=True)                        # [N,1]
        return -jnp.sum(jnp.log(num / (den + 1e-8) + 1e-8)) / n

    sc_loss = branch(n1s, n2b)                           # sim(z1, z2) branch
    mp_loss = branch(n2s, n1b)                           # sim(z2, z1) branch
    out_ref[0, 0] = sc_loss * lam + mp_loss * (1.0 - lam)


def contrast_loss(x1, x2, w1, b1, w2, b2, positive_matrix, *, tau,
                  contrast_lamda):
    """w1, w2 are torch-layout [out, in]; b1, b2 are [1, H]."""
    n, h = x1.shape
    # Lane-dense hidden dim with >= 1 spare lane for the folded-bias "ones"
    # column.  Zero padding is correctness-preserving: ELU(0)=0 and the padded
    # weight rows/cols are zero, so padded lanes never reach the L2 norm.
    hp = pl.cdiv(h + 1, 128) * 128

    def pad2(a, rows, cols):
        r, c = a.shape
        return jnp.pad(a, ((0, rows - r), (0, cols - c)))

    # Stack x1/x2 into one [2N, Hp] bf16 operand (single MLP pass) and append
    # the ones lane at column h.
    x = jnp.concatenate([x1, x2], axis=0).astype(jnp.float32)
    x = jnp.concatenate([x, jnp.ones((2 * n, 1), jnp.float32)], axis=1)
    x = pad2(x, 2 * n, hp).astype(jnp.bfloat16)

    def fold(w, b, carry_ones):
        # y = x_aug @ fold(w, b)  ==  x @ w.T + b  on the first h lanes.
        wt = jnp.concatenate(
            [w.T.astype(jnp.float32), b.reshape(1, h).astype(jnp.float32)],
            axis=0)                                      # [h+1, h]
        wt = pad2(wt, hp, hp)
        if carry_ones:                                   # propagate ones lane
            wt = wt.at[h, h].set(1.0)                    # through layer 1
        return wt.astype(jnp.bfloat16)

    w1a = fold(w1, b1, carry_ones=True)
    w2a = fold(w2, b2, carry_ones=False)                 # col h stays 0 -> z[:,h]=0

    # Binary positive-pair indicator as int8 (1 byte/elem of HBM traffic).
    pos_i8 = (positive_matrix != 0).astype(jnp.int8)

    kernel = functools.partial(_contrast_kernel, inv_tau=1.0 / float(tau),
                               lam=float(contrast_lamda), n=n)
    vmem = pl.BlockSpec(memory_space=pltpu.MemorySpace.VMEM)
    out = pl.pallas_call(
        kernel,
        out_shape=jax.ShapeDtypeStruct((1, 1), jnp.float32),
        in_specs=[vmem, vmem, vmem, vmem],
        out_specs=pl.BlockSpec(memory_space=pltpu.MemorySpace.SMEM),
    )(x, w1a, w2a, pos_i8)
    return out[0, 0]


def reference_loss(x1, x2, w1, b1, w2, b2, pos, *, tau, contrast_lamda):
    """Pure-JAX f32 reference mirroring the PyTorch module."""
    def project(x):
        y = x @ w1.T + b1
        y = jnp.where(y > 0, y, jnp.exp(y) - 1.0)
        return y @ w2.T + b2

    def normalize(z):
        nrm = jnp.sqrt(jnp.sum(z * z, axis=-1, keepdims=True))
        return z / jnp.maximum(nrm, 1e-12)

    n1 = normalize(project(x1))
    n2 = normalize(project(x2))
    sc = jnp.exp(n1 @ n2.T / tau)
    mp = jnp.exp(n2 @ n1.T / tau)
    sc = sc / (jnp.sum(sc, axis=-1, keepdims=True) + 1e-8)
    mp = mp / (jnp.sum(mp, axis=-1, keepdims=True) + 1e-8)
    sc_loss = -jnp.mean(jnp.log(jnp.sum(sc * pos, axis=-1) + 1e-8))
    mp_loss = -jnp.mean(jnp.log(jnp.sum(mp * pos, axis=-1) + 1e-8))
    return sc_loss * contrast_lamda + mp_loss * (1.0 - contrast_lamda)


def xavier_uniform(key, fan_in, fan_out, gain):
    bound = gain * jnp.sqrt(6.0 / (fan_in + fan_out))
    return jax.random.uniform(key, (fan_out, fan_in), jnp.float32,
                              minval=-bound, maxval=bound)


if __name__ == "__main__":
    N, H = 8, 32
    tau = 0.5
    contrast_lamda = 0.5

    key = jax.random.PRNGKey(0)
    k_x1, k_x2, k_w1, k_b1, k_w2, k_b2 = jax.random.split(key, 6)

    x1 = jax.random.normal(k_x1, (N, H), jnp.float32)
    x2 = jax.random.normal(k_x2, (N, H), jnp.float32)

    # project_linear = Linear(H,H) -> ELU -> Linear(H,H); xavier(gain=1.414)
    gain = 1.414
    W1 = xavier_uniform(k_w1, H, H, gain)                 # [out, in]
    W2 = xavier_uniform(k_w2, H, H, gain)
    bbound = 1.0 / jnp.sqrt(H)
    b1 = jax.random.uniform(k_b1, (1, H), jnp.float32, -bbound, bbound)
    b2 = jax.random.uniform(k_b2, (1, H), jnp.float32, -bbound, bbound)

    # Deterministic binary positive matrix: self + next neighbor (ring).
    eye = jnp.eye(N, dtype=jnp.float32)
    positive_matrix = jnp.clip(eye + jnp.roll(eye, 1, axis=1), 0.0, 1.0)

    loss = contrast_loss(x1, x2, W1, b1, W2, b2, positive_matrix,
                         tau=tau, contrast_lamda=contrast_lamda)
    loss = jax.block_until_ready(loss)

    ref = reference_loss(x1, x2, W1, b1, W2, b2, positive_matrix,
                         tau=tau, contrast_lamda=contrast_lamda)
    ref = jax.block_until_ready(ref)

    assert jnp.isfinite(loss), "loss is not finite"
    # bf16 MXU operands vs. the pure-f32 reference: expected rel err ~1e-3.
    err = abs(float(loss) - float(ref))
    assert err <= 1e-2 * abs(float(ref)) + 1e-3, (float(loss), float(ref), err)
    print("KERNEL_OK")
</pallas_src>

<mosaic_0001>
module attributes {stable_mosaic.version = 11 : i64} {
  func.func @_contrast_kernel(%arg0: memref<16x128xbf16, #tpu.memory_space<vmem>>, %arg1: memref<128x128xbf16, #tpu.memory_space<vmem>>, %arg2: memref<128x128xbf16, #tpu.memory_space<vmem>>, %arg3: memref<8x8xi8, #tpu.memory_space<vmem>>, %arg4: memref<1x1xf32, #tpu.memory_space<smem>>) attributes {dimension_semantics = [], scalar_prefetch = 0 : i64, scratch_operands = 0 : i64, tpu.core_type = #tpu.core_type<tc>} {
    %c0 = arith.constant 0 : index
    %c0_0 = arith.constant 0 : index
    %0 = vector.load %arg0[%c0, %c0_0] : memref<16x128xbf16, #tpu.memory_space<vmem>>, vector<16x128xbf16>
    %c0_1 = arith.constant 0 : index
    %c0_2 = arith.constant 0 : index
    %1 = vector.load %arg1[%c0_1, %c0_2] : memref<128x128xbf16, #tpu.memory_space<vmem>>, vector<128x128xbf16>
    %cst = arith.constant dense<0.000000e+00> : vector<16x128xf32>
    %2 = tpu.matmul %0, %1, %cst {dimension_numbers = #tpu.dot_dimension_numbers<[1], [0], [0], [1], [0, 0, 1, 1], [], []>} : vector<16x128xbf16>, vector<128x128xbf16>, vector<16x128xf32> -> vector<16x128xf32>
    %cst_3 = arith.constant 0.000000e+00 : f32
    %3 = vector.broadcast %cst_3 : f32 to vector<16x128xf32>
    %4 = arith.cmpf ogt, %2, %3 : vector<16x128xf32>
    %5 = math.exp %2 : vector<16x128xf32>
    %cst_4 = arith.constant 1.000000e+00 : f32
    %6 = vector.broadcast %cst_4 : f32 to vector<16x128xf32>
    %7 = arith.subf %5, %6 : vector<16x128xf32>
    %8 = arith.select %4, %2, %7 : vector<16x128xi1>, vector<16x128xf32>
    %9 = arith.truncf %8 : vector<16x128xf32> to vector<16x128xbf16>
    %c0_5 = arith.constant 0 : index
    %c0_6 = arith.constant 0 : index
    %10 = vector.load %arg2[%c0_5, %c0_6] : memref<128x128xbf16, #tpu.memory_space<vmem>>, vector<128x128xbf16>
    %cst_7 = arith.constant dense<0.000000e+00> : vector<16x128xf32>
    %11 = tpu.matmul %9, %10, %cst_7 {dimension_numbers = #tpu.dot_dimension_numbers<[1], [0], [0], [1], [0, 0, 1, 1], [], []>} : vector<16x128xbf16>, vector<128x128xbf16>, vector<16x128xf32> -> vector<16x128xf32>
    %12 = arith.mulf %11, %11 : vector<16x128xf32>
    %cst_8 = arith.constant dense<0.000000e+00> : vector<16xf32>
    %13 = vector.multi_reduction <add>, %12, %cst_8 [1] : vector<16x128xf32> to vector<16xf32>
    %14 = vector.shape_cast %13 : vector<16xf32> to vector<16x1xf32>
    %cst_9 = arith.constant 1.000000e-24 : f32
    %15 = vector.broadcast %cst_9 : f32 to vector<16x1xf32>
    %16 = arith.maximumf %14, %15 : vector<16x1xf32>
    %17 = math.rsqrt %16 : vector<16x1xf32>
    %18 = vector.broadcast %17 : vector<16x1xf32> to vector<16x128xf32>
    %19 = arith.mulf %11, %18 : vector<16x128xf32>
    %20 = vector.extract_strided_slice %19 {offsets = [0, 0], sizes = [8, 128], strides = [1, 1]} : vector<16x128xf32> to vector<8x128xf32>
    %21 = vector.extract_strided_slice %19 {offsets = [8, 0], sizes = [8, 128], strides = [1, 1]} : vector<16x128xf32> to vector<8x128xf32>
    %22 = arith.truncf %20 : vector<8x128xf32> to vector<8x128xbf16>
    %23 = arith.truncf %21 : vector<8x128xf32> to vector<8x128xbf16>
    %cst_10 = arith.constant 2.000000e+00 : f32
    %24 = vector.broadcast %cst_10 : f32 to vector<8x128xf32>
    %25 = arith.mulf %20, %24 : vector<8x128xf32>
    %26 = arith.truncf %25 : vector<8x128xf32> to vector<8x128xbf16>
    %cst_11 = arith.constant 2.000000e+00 : f32
    %27 = vector.broadcast %cst_11 : f32 to vector<8x128xf32>
    %28 = arith.mulf %21, %27 : vector<8x128xf32>
    %29 = arith.truncf %28 : vector<8x128xf32> to vector<8x128xbf16>
    %c0_12 = arith.constant 0 : index
    %c0_13 = arith.constant 0 : index
    %30 = vector.load %arg3[%c0_12, %c0_13] : memref<8x8xi8, #tpu.memory_space<vmem>>, vector<8x8xi8>
    %31 = arith.sitofp %30 : vector<8x8xi8> to vector<8x8xf32>
    %cst_14 = arith.constant 5.000000e-01 : f32
    %32 = vector.broadcast %cst_14 : f32 to vector<8x8xf32>
    %33 = arith.cmpf ogt, %31, %32 : vector<8x8xf32>
    %cst_15 = arith.constant dense<0.000000e+00> : vector<8x8xf32>
    %34 = tpu.matmul %26, %23, %cst_15 {dimension_numbers = #tpu.dot_dimension_numbers<[1], [1], [0], [0], [0, 0, 1, 0], [], []>} : vector<8x128xbf16>, vector<8x128xbf16>, vector<8x8xf32> -> vector<8x8xf32>
    %35 = math.exp %34 : vector<8x8xf32>
    %cst_16 = arith.constant 0.000000e+00 : f32
    %36 = vector.broadcast %cst_16 : f32 to vector<8x8xf32>
    %37 = arith.select %33, %35, %36 : vector<8x8xi1>, vector<8x8xf32>
    %cst_17 = arith.constant dense<0.000000e+00> : vector<8xf32>
    %38 = vector.multi_reduction <add>, %37, %cst_17 [1] : vector<8x8xf32> to vector<8xf32>
    %39 = vector.shape_cast %38 : vector<8xf32> to vector<8x1xf32>
    %cst_18 = arith.constant dense<0.000000e+00> : vector<8xf32>
    %40 = vector.multi_reduction <add>, %35, %cst_18 [1] : vector<8x8xf32> to vector<8xf32>
    %41 = vector.shape_cast %40 : vector<8xf32> to vector<8x1xf32>
    %cst_19 = arith.constant 9.99999993E-9 : f32
    %42 = vector.broadcast %cst_19 : f32 to vector<8x1xf32>
    %43 = arith.addf %41, %42 : vector<8x1xf32>
    %44 = arith.divf %39, %43 : vector<8x1xf32>
    %cst_20 = arith.constant 9.99999993E-9 : f32
    %45 = vector.broadcast %cst_20 : f32 to vector<8x1xf32>
    %46 = arith.addf %44, %45 : vector<8x1xf32>
    %47 = math.log %46 : vector<8x1xf32>
    %48 = vector.shape_cast %47 : vector<8x1xf32> to vector<1x8x1xf32>
    %cst_21 = arith.constant dense<0.000000e+00> : vector<1xf32>
    %49 = vector.multi_reduction <add>, %48, %cst_21 [1, 2] : vector<1x8x1xf32> to vector<1xf32>
    %50 = vector.shape_cast %49 : vector<1xf32> to vector<1x1x1xf32>
    %51 = vector.extract %50[0, 0, 0] : f32 from vector<1x1x1xf32>
    %cst_22 = arith.constant 0.000000e+00 : f32
    %52 = arith.subf %cst_22, %51 : f32
    %cst_23 = arith.constant 8.000000e+00 : f32
    %53 = arith.divf %52, %cst_23 : f32
    %cst_24 = arith.constant dense<0.000000e+00> : vector<8x8xf32>
    %54 = tpu.matmul %29, %22, %cst_24 {dimension_numbers = #tpu.dot_dimension_numbers<[1], [1], [0], [0], [0, 0, 1, 0], [], []>} : vector<8x128xbf16>, vector<8x128xbf16>, vector<8x8xf32> -> vector<8x8xf32>
    %55 = math.exp %54 : vector<8x8xf32>
    %cst_25 = arith.constant 0.000000e+00 : f32
    %56 = vector.broadcast %cst_25 : f32 to vector<8x8xf32>
    %57 = arith.select %33, %55, %56 : vector<8x8xi1>, vector<8x8xf32>
    %cst_26 = arith.constant dense<0.000000e+00> : vector<8xf32>
    %58 = vector.multi_reduction <add>, %57, %cst_26 [1] : vector<8x8xf32> to vector<8xf32>
    %59 = vector.shape_cast %58 : vector<8xf32> to vector<8x1xf32>
    %cst_27 = arith.constant dense<0.000000e+00> : vector<8xf32>
    %60 = vector.multi_reduction <add>, %55, %cst_27 [1] : vector<8x8xf32> to vector<8xf32>
    %61 = vector.shape_cast %60 : vector<8xf32> to vector<8x1xf32>
    %cst_28 = arith.constant 9.99999993E-9 : f32
    %62 = vector.broadcast %cst_28 : f32 to vector<8x1xf32>
    %63 = arith.addf %61, %62 : vector<8x1xf32>
    %64 = arith.divf %59, %63 : vector<8x1xf32>
    %cst_29 = arith.constant 9.99999993E-9 : f32
    %65 = vector.broadcast %cst_29 : f32 to vector<8x1xf32>
    %66 = arith.addf %64, %65 : vector<8x1xf32>
    %67 = math.log %66 : vector<8x1xf32>
    %68 = vector.shape_cast %67 : vector<8x1xf32> to vector<1x8x1xf32>
    %cst_30 = arith.constant dense<0.000000e+00> : vector<1xf32>
    %69 = vector.multi_reduction <add>, %68, %cst_30 [1, 2] : vector<1x8x1xf32> to vector<1xf32>
    %70 = vector.shape_cast %69 : vector<1xf32> to vector<1x1x1xf32>
    %71 = vector.extract %70[0, 0, 0] : f32 from vector<1x1x1xf32>
    %cst_31 = arith.constant 0.000000e+00 : f32
    %72 = arith.subf %cst_31, %71 : f32
    %cst_32 = arith.constant 8.000000e+00 : f32
    %73 = arith.divf %72, %cst_32 : f32
    %cst_33 = arith.constant 5.000000e-01 : f32
    %74 = arith.mulf %53, %cst_33 : f32
    %cst_34 = arith.constant 5.000000e-01 : f32
    %75 = arith.mulf %73, %cst_34 : f32
    %76 = arith.addf %74, %75 : f32
    %c0_35 = arith.constant 0 : index
    %c0_36 = arith.constant 0 : index
    %77 = memref.load %arg4[%c0_35, %c0_36] : memref<1x1xf32, #tpu.memory_space<smem>>
    memref.store %76, %arg4[%c0_35, %c0_36] : memref<1x1xf32, #tpu.memory_space<smem>>
    return
  }
}

</mosaic_0001>

<bundles_post_ra>
// kernel: tpu_custom_call.1
= control target key start
LH: loop header
LB: loop body
LE: loop exit
PB: predicated region body
PF: predicated region fallthrough
CT: control target
= control target key end

     0   :  { %9 = vsyncpa [#allocation3], 0  ;;  %s686_s0 = inlined_call_operand.hbm [shape: bf16[16,128], index: 0, kind: input, shape index: {}]   ;;  %s687_s1 = inlined_call_operand.hbm [shape: bf16[128,128], index: 1, kind: input, shape index: {}]   ;;  %s688_s2 = inlined_call_operand.hbm [shape: bf16[128,128], index: 2, kind: input, shape index: {}]   ;;  %s689_s3 = inlined_call_operand.vmem [shape: s8[8,8], index: 3, kind: input, shape index: {}]   ;;  %s690_s4 = inlined_call_operand.hbm [shape: f32[1,1], index: 4, kind: output, shape index: {}]  }
   0x1   :  { %10 = vsyncpa [#allocation6], 0 }
   0x2   :  { %11 = vsyncpa [#allocation4], 0  ;;  %s29_s17 = sshll.u32 %s687_s1, 4  ;;  %s639_s18 = smov [#allocation5]   ;;  %s30_s17 = int_to_ptr.hbm [resolvable:$true] %s29_s17 }
   0x3   :  { %s31_s19 = sshll.u32 %s639_s18, 4  ;;  %s16_s22 = sshll.u32 %s686_s0, 4  ;;  %s32_s19 = int_to_ptr.vmem [resolvable:$true] %s31_s19  ;;  %s17_s22 = int_to_ptr.hbm [resolvable:$true] %s16_s22 }
   0x4   :  { %s640_s23 = smov 64   ;;  %s641_s24 = smov 4  }
   0x5   :  { %37 = dma.hbm_to_vmem [thread:$0]  %s30_s17, 1024, %s32_s19, [#allocation6], %s640_s23, %s640_s23, %s641_s24  }
   0x6   :  { %s642_s25 = smov [#allocation2]   ;;  %s42_s29 = sshll.u32 %s688_s2, 4  ;;  %s43_s29 = int_to_ptr.hbm [resolvable:$true] %s42_s29 }
   0x7   :  { %s18_s26 = sshll.u32 %s642_s25, 4  ;;  %s643_s1 = smov [#allocation7]   ;;  %s19_s26 = int_to_ptr.vmem [resolvable:$true] %s18_s26 }
   0x8   :  { %24 = dma.hbm_to_vmem [thread:$0]  %s17_s22, 128, %s19_s26, [#allocation3], %s640_s23, %s640_s23, %s641_s24  }
   0x9   :  { %s44_s30 = sshll.u32 %s643_s1, 4  ;;  %s45_s30 = int_to_ptr.vmem [resolvable:$true] %s44_s30 }
   0xa   :  { %50 = dma.hbm_to_vmem [thread:$0]  %s43_s29, 1024, %s45_s30, [#allocation6], %s640_s23, %s640_s23, %s641_s24  }
   0xb   :  { %633 = dma.done.wait [#allocation3], 128  }
   0xc   :  { %634 = vsyncadd [#allocation3], 4294967168 }
   0xd   :  { %635 = dma.done.wait [#allocation6], 2048  }
   0xe   :  { %636 = vsyncadd [#allocation6], 4294965248  ;;  %v505_v0 = vld [vmem:[#allocation5 + $0x38] sm:$0xff]  ;;  %v504_v1 = vld [vmem:[#allocation5 + $0x30] sm:$0xff]  ;;  %vm297_vm8 = vcmask 64512   ;;  %s415_s13 = sshll.u32 %s690_s4, 4  ;;  %s416_s13 = int_to_ptr.hbm [resolvable:$true] %s415_s13 }
   0xf   :  { %138 = vmatpush.bf16.msra.mxu0 %v505_v0  ;;  %v513_v2 = vld [vmem:[#allocation7 + $0x38] sm:$0xff]  ;;  %v512_v3 = vld [vmem:[#allocation7 + $0x30] sm:$0xff]  ;;  %v503_v4 = vld [vmem:[#allocation5 + $0x28] sm:$0xff]  ;;  %s645_s17 = smov [#allocation8]  }
  0x10   :  { %227 = vmatpush.bf16.msra.mxu1 %v513_v2  ;;  %v502_v5 = vld [vmem:[#allocation5 + $0x20] sm:$0xff]  ;;  %v501_v6 = vld [vmem:[#allocation5 + $0x18] sm:$0xff]  ;;  %v500_v7 = vld [vmem:[#allocation5 + $0x10] sm:$0xff] }
  0x11   :  { %v499_v8 = vld [vmem:[#allocation5 + $0x8] sm:$0xff]  ;;  %v498_v9 = vld [vmem:[#allocation5] sm:$0xff]  ;;  %v497_v10 = vld [vmem:[#allocation2] sm:$0xff] }
  0x12   :  { %v511_v11 = vld [vmem:[#allocation7 + $0x28] sm:$0xff]  ;;  %v510_v12 = vld [vmem:[#allocation7 + $0x20] sm:$0xff]  ;;  %v509_v13 = vld [vmem:[#allocation7 + $0x18] sm:$0xff] }
  0x13   :  { %139 = vmatpush.bf16.msra.mxu0 %v504_v1  ;;  %v508_v14 = vld [vmem:[#allocation7 + $0x10] sm:$0xff]  ;;  %v507_v15 = vld [vmem:[#allocation7 + $0x8] sm:$0xff]  ;;  %v506_v16 = vld [vmem:[#allocation7] sm:$0xff] }
  0x14   :  { %228 = vmatpush.bf16.msra.mxu1 %v512_v3  ;;  %v277_v59 = vld [vmem:[%s689_s3] sm:$0x3] }
  0x15   :  { %v278_v62 = vunpack.c.0.s8 %v277_v59 }
  0x17   :  { %140 = vmatpush.bf16.msra.mxu0 %v503_v4  ;;  %v279_v1 = vcvt.s32.f32 %v278_v62 }
  0x18   :  { %229 = vmatpush.bf16.msra.mxu1 %v511_v11 }
  0x19   :  { %vm280_vm9 = vcmp.gt.f32.partialorder %v279_v1, 0.5 }
  0x1b   :  { %141 = vmatpush.bf16.msra.mxu0 %v502_v5 }
  0x1c   :  { %230 = vmatpush.bf16.msra.mxu1 %v510_v12 }
  0x1f   :  { %142 = vmatpush.bf16.msra.mxu0 %v501_v6 }
  0x20   :  { %231 = vmatpush.bf16.msra.mxu1 %v509_v13 }
  0x23   :  { %143 = vmatpush.bf16.msra.mxu0 %v500_v7 }
  0x24   :  { %232 = vmatpush.bf16.msra.mxu1 %v508_v14 }
  0x27   :  { %144 = vmatpush.bf16.msra.mxu0 %v499_v8 }
  0x28   :  { %233 = vmatpush.bf16.msra.mxu1 %v507_v15 }
  0x2b   :  { %145 = vmatpush.bf16.msra.mxu0 %v498_v9 }
  0x2c   :  { %234 = vmatpush.bf16.msra.mxu1 %v506_v16 }
  0x2e   :  { %146 = vmatmul.bf16.vlgmr.msra.gmra.mxu0 %v497_v10 }
  0xab   :  { %v147_v17 = vpop.f32.mrf.mxu0 }
  0xac   :  { %v154_v18 = vmul.f32 1.442695, %v147_v17  ;;  %vm152_vm0 = vcmp.gt.f32.partialorder %v147_v17, 0.0 }
  0xae   :  { %527 = vpow2.f32 %v154_v18 }
  0xb3   :  { %v149_v19 = vpop.f32.mrf.mxu0 }
  0xb4   :  { %v156_v20 = vmul.f32 1.442695, %v149_v19  ;;  %v528_v21 = vpop.eup %527  ;;  %vm153_vm1 = vcmp.gt.f32.partialorder %v149_v19, 0.0 }
  0xb5   :  { %v463_v22 = vadd.f32 -1.0, %v528_v21 }
  0xb6   :  { %529 = vpow2.f32 %v156_v20 }
  0xb7   :  { %v160_v26 = vsel %vm152_vm0, %v147_v17, %v463_v22 }
  0xbc   :  { %v530_v23 = vpop.eup %529 }
  0xbd   :  { %v464_v24 = vadd.f32 -1.0, %v530_v23 }
  0xbf   :  { %v161_v25 = vsel %vm153_vm1, %v149_v19, %v464_v24 }
  0xc0   :  { %v162_v27 = vpack.c.bf16 %v161_v25, %v160_v26 }
  0xc2   :  { %235 = vmatmul.bf16.vlgmr.msra.gmra.mxu1 %v162_v27 }
 0x13f   :  { %v236_v28 = vpop.f32.mrf.mxu1 }
 0x140   :  { %v241_v29 = vmul.f32 %v236_v28, %v236_v28 }
 0x142   :  { %243 = vadd.xlane.f32.xlu0 %v241_v29 }
 0x147   :  { %v238_v30 = vpop.f32.mrf.mxu1 }
 0x148   :  { %v242_v31 = vmul.f32 %v238_v30, %v238_v30 }
 0x14a   :  { %245 = vadd.xlane.f32.xlu0 %v242_v31 }
 0x1b5   :  { %v244_v32 = vpop.xlane.xlu0 %243 }
 0x1b6   :  { %v247_v33 = vmax.f32 %v244_v32, 1e-24 }
 0x1b8   :  { %531 = vrsqrt.f32 %v247_v33  ;;  %vm255_vm3 = vweird.f32 %v247_v33 }
 0x1bd   :  { %v246_v34 = vpop.xlane.xlu0 %245 }
 0x1be   :  { %v532_v35 = vpop.eup %531  ;;  %v248_v36 = vmax.f32 %v246_v34, 1e-24 }
 0x1bf   :  { %v250_v37 = vmul.f32 %v532_v35, %v247_v33  ;;  %vm256_vm2 = vweird.f32 %v532_v35 }
 0x1c0   :  { %533 = vrsqrt.f32 %v248_v36  ;;  %vm257_vm4 = vmor %vm255_vm3, %vm256_vm2  ;;  %vm265_vm6 = vweird.f32 %v248_v36  ;;  %vm323_vm2 = vcmask 7168  }
 0x1c1   :  { %v251_v38 = vmul.f32 %v532_v35, %v250_v37 }
 0x1c3   :  { %v252_v39 = vmul.f32 0.5, %v251_v38 }
 0x1c5   :  { %v253_v40 = vsub.f32 1.5, %v252_v39 }
 0x1c6   :  { %v534_v41 = vpop.eup %533 }
 0x1c7   :  { %v260_v42 = vmul.f32 %v534_v41, %v248_v36  ;;  %v254_v43 = vmul.f32 %v532_v35, %v253_v40  ;;  %vm266_vm5 = vweird.f32 %v534_v41 }
 0x1c8   :  { %vm267_vm7 = vmor %vm265_vm6, %vm266_vm5 }
 0x1c9   :  { %v261_v44 = vmul.f32 %v534_v41, %v260_v42  ;;  %v258_v45 = vsel %vm257_vm4, %v532_v35, %v254_v43 }
 0x1ca   :  { %v269_v46 = vmul.f32 %v258_v45, %v236_v28 }
 0x1cb   :  { %v262_v47 = vmul.f32 0.5, %v261_v44 }
 0x1cc   :  { %v271_v48 = vpack.c.bf16 %v269_v46, %v269_v46  ;;  %v273_v56 = vmul.f32 2.0, %v269_v46 }
 0x1cd   :  { %v263_v49 = vsub.f32 1.5, %v262_v47  ;;  %v644_v47 = vmov 8.0  }
 0x1ce   :  { %351 = vmatpush.bf16.xpose.msra.mxu3 %v271_v48  ;;  %v274_v57 = vpack.c.bf16 %v273_v56, %v273_v56 }
 0x1cf   :  { %v264_v50 = vmul.f32 %v534_v41, %v263_v49 }
 0x1d1   :  { %v268_v51 = vsel %vm267_vm7, %v534_v41, %v264_v50 }
 0x1d2   :  { %v270_v52 = vmul.f32 %v268_v51, %v238_v30 }
 0x1d4   :  { %v272_v53 = vpack.c.bf16 %v270_v52, %v270_v52  ;;  %v275_v54 = vmul.f32 2.0, %v270_v52 }
 0x1d6   :  { %288 = vmatpush.bf16.xpose.msra.mxu2 %v272_v53  ;;  %v276_v55 = vpack.c.bf16 %v275_v54, %v275_v54 }
 0x1d8   :  { %352 = vmatmul.bf16.vlgmr.msra.gmra.mxu3 %v276_v55 }
 0x1dd   :  { %289 = vmatmul.bf16.vlgmr.msra.gmra.mxu2 %v274_v57 }
 0x25b   :  { %v353_v58 = vpop.f32.mrf.mxu3 }
 0x25c   :  { %v357_v63 = vmul.f32 1.442695, %v353_v58 }
 0x260   :  { %v290_v60 = vpop.f32.mrf.mxu2 }
 0x261   :  { %v294_v61 = vmul.f32 1.442695, %v290_v60 }
 0x263   :  { %535 = vpow2.f32 %v294_v61  ;;  %v355_v0 = vpop.f32.mrf.mxu3 }
 0x264   :  { %537 = vpow2.f32 %v357_v63 }
 0x268   :  { %v292_v2 = vpop.f32.mrf.mxu2 }
 0x269   :  { %v536_v3 = vpop.eup %535 }
 0x26a   :  { %v301_v4 = vsel %vm297_vm8, %v536_v3, 0.0  ;;  %v296_v5 = vsel %vm280_vm9, %v536_v3, 0.0  ;;  %v538_v7 = vpop.eup %537 }
 0x26b   :  { %302 = vadd.xlane.f32.xlu1 %v301_v4  ;;  %v298_v6 = vsel %vm297_vm8, %v296_v5, 0.0  ;;  %v359_v8 = vsel %vm280_vm9, %v538_v7, 0.0  ;;  %v363_v9 = vsel %vm297_vm8, %v538_v7, 0.0 }
 0x26c   :  { %299 = vadd.xlane.f32.xlu2 %v298_v6  ;;  %v360_v10 = vsel %vm297_vm8, %v359_v8, 0.0 }
 0x273   :  { %364 = vadd.xlane.f32.xlu1 %v363_v9 }
 0x274   :  { %361 = vadd.xlane.f32.xlu2 %v360_v10 }
 0x2de   :  { %v303_v11 = vpop.xlane.xlu1 %302 }
 0x2df   :  { %v304_v12 = vadd.f32 1e-08, %v303_v11  ;;  %v300_v24 = vpop.xlane.xlu2 %299 }
 0x2e1   :  { %539 = vrcp.f32 %v304_v12  ;;  %v316_v18 = vand.u32 2147483648, %v304_v12  ;;  %v314_v20 = vand.u32 2147483647, %v304_v12  ;;  %vm310_vm11 = vweird.f32 %v304_v12 }
 0x2e3   :  { %v317_v23 = vor.u32 1.1754944e-38, %v316_v18  ;;  %vm315_vm13 = vcmp.eq.f32.partialorder %v314_v20, 8.507059e+37 }
 0x2e6   :  { %v365_v13 = vpop.xlane.xlu1 %364 }
 0x2e7   :  { %v540_v14 = vpop.eup %539  ;;  %v366_v15 = vadd.f32 1e-08, %v365_v13  ;;  %v362_v38 = vpop.xlane.xlu2 %361 }
 0x2e8   :  { %v306_v16 = vmul.f32 %v540_v14, %v304_v12  ;;  %vm311_vm10 = vweird.f32 %v540_v14 }
 0x2e9   :  { %541 = vrcp.f32 %v366_v15  ;;  %vm312_vm12 = vmor %vm310_vm11, %vm311_vm10  ;;  %v378_v30 = vand.u32 2147483648, %v366_v15  ;;  %v376_v33 = vand.u32 2147483647, %v366_v15  ;;  %vm372_vm15 = vweird.f32 %v366_v15 }
 0x2ea   :  { %v307_v17 = vsub.f32 1.0, %v306_v16 }
 0x2eb   :  { %v379_v35 = vor.u32 1.1754944e-38, %v378_v30  ;;  %vm377_vm1 = vcmp.eq.f32.partialorder %v376_v33, 8.507059e+37 }
 0x2ec   :  { %v308_v19 = vmul.f32 %v540_v14, %v307_v17 }
 0x2ee   :  { %v309_v21 = vadd.f32 %v540_v14, %v308_v19 }
 0x2ef   :  { %v542_v22 = vpop.eup %541 }
 0x2f0   :  { %v313_v25 = vsel %vm312_vm12, %v540_v14, %v309_v21  ;;  %v368_v26 = vmul.f32 %v542_v22, %v366_v15  ;;  %vm373_vm14 = vweird.f32 %v542_v22 }
 0x2f1   :  { %v318_v27 = vsel %vm315_vm13, %v317_v23, %v313_v25  ;;  %vm374_vm0 = vmor %vm372_vm15, %vm373_vm14 }
 0x2f2   :  { %v319_v28 = vmul.f32 %v318_v27, %v300_v24  ;;  %v369_v29 = vsub.f32 1.0, %v368_v26 }
 0x2f4   :  { %v320_v31 = vadd.f32 1e-08, %v319_v28  ;;  %v370_v32 = vmul.f32 %v542_v22, %v369_v29 }
 0x2f6   :  { %543 = vlog2.f32 %v320_v31  ;;  %v371_v34 = vadd.f32 %v542_v22, %v370_v32 }
 0x2f8   :  { %v375_v36 = vsel %vm374_vm0, %v542_v22, %v371_v34 }
 0x2f9   :  { %v380_v37 = vsel %vm377_vm1, %v379_v35, %v375_v36 }
 0x2fa   :  { %v381_v39 = vmul.f32 %v380_v37, %v362_v38 }
 0x2fc   :  { %v544_v40 = vpop.eup %543  ;;  %v382_v41 = vadd.f32 1e-08, %v381_v39 }
 0x2fd   :  { %v322_v42 = vmul.f32 0.6931472, %v544_v40 }
 0x2fe   :  { %545 = vlog2.f32 %v382_v41 }
 0x2ff   :  { %v324_v43 = vsel %vm323_vm2, %v322_v42, 0.0  ;;  %547 = vrcp.f32 %v644_v47 }
 0x300   :  { %325 = vadd.xlane.f32.xlu0 %v324_v43 }
 0x304   :  { %v546_v44 = vpop.eup %545 }
 0x305   :  { %v384_v45 = vmul.f32 0.6931472, %v546_v44  ;;  %v548_v48 = vpop.eup %547 }
 0x306   :  { %v336_v49 = vmul.f32 8.0, %v548_v48  ;;  %vm340_vm3 = vweird.f32 %v548_v48 }
 0x307   :  { %v385_v46 = vsel %vm323_vm2, %v384_v45, 0.0 }
 0x308   :  { %386 = vadd.xlane.f32.xlu1 %v385_v46  ;;  %v337_v50 = vsub.f32 1.0, %v336_v49 }
 0x30a   :  { %v338_v54 = vmul.f32 %v548_v48, %v337_v50 }
 0x30c   :  { %v339_v57 = vadd.f32 %v548_v48, %v338_v54 }
 0x30e   :  { %v341_v63 = vsel %vm340_vm3, %v548_v48, %v339_v57 }
 0x373   :  { %v326_v51 = vpop.xlane.xlu0 %325 }
 0x374   :  { %v327_v52 = vrot.slane %v326_v51, 4 }
 0x376   :  { %v328_v53 = vadd.f32 %v327_v52, %v326_v51 }
 0x378   :  { %v329_v55 = vrot.slane %v328_v53, 2 }
 0x37a   :  { %v330_v56 = vadd.f32 %v329_v55, %v328_v53 }
 0x37b   :  { %v387_v58 = vpop.xlane.xlu1 %386 }
 0x37c   :  { %v388_v59 = vrot.slane %v387_v58, 4  ;;  %v331_v60 = vrot.slane %v330_v56, 1 }
 0x37e   :  { %v389_v61 = vadd.f32 %v388_v59, %v387_v58  ;;  %v332_v62 = vadd.f32 %v331_v60, %v330_v56 }
 0x380   :  { %v390_v0 = vrot.slane %v389_v61, 2  ;;  %514 = vpush %v332_v62 }
 0x381   :  { %516 = vpush %v341_v63 }
 0x382   :  { %v391_v1 = vadd.f32 %v390_v0, %v389_v61 }
 0x384   :  { %v392_v2 = vrot.slane %v391_v1, 1 }
 0x386   :  { %v393_v3 = vadd.f32 %v392_v2, %v391_v1 }
 0x388   :  { %518 = vpush %v393_v3 }
 0x3b1   :  { %s515_s3 = spop %514 }
 0x3b2   :  { %s334_s5 = ssub.f32 0.0, %s515_s3  ;;  %s517_s6 = spop %516 }
 0x3b4   :  { %s343_s7 = smul.f32 %s517_s6, %s334_s5 }
 0x3b6   :  { %s405_s14 = smul.f32 0.5, %s343_s7 }
 0x3b9   :  { %s519_s8 = spop %518 }
 0x3ba   :  { %s395_s9 = ssub.f32 0.0, %s519_s8 }
 0x3bc   :  { %s404_s10 = smul.f32 %s517_s6, %s395_s9 }
 0x3be   :  { %s406_s15 = smul.f32 0.5, %s404_s10 }
 0x3c0   :  { %s407_s16 = sadd.f32 %s406_s15, %s405_s14 }
 0x3c2   :  { %409 = sst [smem:[#allocation8]] %s407_s16 }
 0x3c3   :  { %418 = dma.smem_to_hbm %s645_s17, 16, %s416_s13, [#allocation4]  }
 0x3c4   :  { %637 = dma.done.wait [#allocation4], 16  }
 0x3c5   :  { %638 = vsyncadd [#allocation4], 4294967280 }
 0x3c6   :  { %423 = sfence }
 0x3c7   :  { %424 = vsyncpa [#allocation3], 1 }
 0x3c8   :  { %425 = vsyncpa [#allocation6], 1 }
 0x3c9   :  { %426 = vsyncpa [#allocation4], 1 }

</bundles_post_ra>
